<compile_context>
chip_gen: v7x
topology: tpu7x:2x2x1
jax: 0.10.0
libtpu: 0.0.40
codegen_flags: <defaults>
</compile_context>

<pallas_src>
import jax
import jax.numpy as jnp
from jax.experimental import pallas as pl
from jax.experimental.pallas import tpu as pltpu


def _patch_proj_kernel(x_ref, w_ref, b_ref, o_ref):
    # x_ref: (TILE_M, K_pad) compute dtype   patch tile
    # w_ref: (K_pad, N_pad)  compute dtype   projection weight (canonical KxN)
    # b_ref: (1, N_pad)      f32             bias
    # o_ref: (TILE_M, N_pad) out dtype
    acc = jnp.dot(x_ref[...], w_ref[...], preferred_element_type=jnp.float32)
    o_ref[...] = (acc + b_ref[...]).astype(o_ref.dtype)


def _round_up(x, m):
    return (x + m - 1) // m * m


def _vmem_footprint_bytes(tile_m, k_pad, n_pad, in_bytes, out_bytes):
    return (2 * tile_m * k_pad * in_bytes      # x   (double buffered)
            + 1 * k_pad * n_pad * in_bytes     # w   (single buffered)
            + 1 * n_pad * 4                    # b   (single buffered, f32)
            + 2 * tile_m * n_pad * out_bytes)  # out (double buffered)


def _pick_tile_m(M, k_pad, n_pad, in_bytes, out_bytes,
                 budget=24 * 1024 * 1024):
    """Largest sublane-legal M tile <= 1024 that fits the VMEM budget and
    yields >= 2 roughly even grid blocks (v7x megacore balance)."""
    tile = 1024
    while tile > 8 and _vmem_footprint_bytes(tile, k_pad, n_pad,
                                             in_bytes, out_bytes) > budget:
        tile //= 2
    tile = min(tile, M)
    if M >= 8:
        tile = max((tile // 8) * 8, 8)
        if pl.cdiv(M, tile) < 2 and M > 8:
            half = _round_up((M + 1) // 2, 8)
            if 8 <= half < M:
                tile = half
    else:
        tile = M  # block == full dim is always legal
    return tile


def vit_patch_embeddings(pixel_values, weight, bias, patch_size,
                         *, out_dtype=jnp.float32,
                         compute_dtype=jnp.bfloat16):
    """ViT patch-embedding forward.

    pixel_values: (B, C, H, W) float32  (NCHW, PyTorch layout)
    weight:       (hidden, C, p, p)     (PyTorch Conv2d weight layout)
    bias:         (hidden,)
    returns       (B, num_patches, hidden) in out_dtype

    Note: compute_dtype=bfloat16 (MXU fast path, half the input DMA bytes) is
    a deliberate, documented precision deviation from PyTorch's f32 Conv2d;
    accumulation is always f32. Use compute_dtype=jnp.float32 for bit-closer
    comparison against fp32 checkpoints. Emit out_dtype=bfloat16 when the
    downstream ViT stack runs in bf16 (halves store traffic).
    """
    B, C, H, W = pixel_values.shape
    hidden = weight.shape[0]
    p = patch_size
    if H % p != 0 or W % p != 0:
        raise ValueError(f"image size ({H},{W}) not divisible by patch {p}")
    gh, gw = H // p, W // p
    num_patches = gh * gw

    M = B * num_patches
    K = C * p * p
    N = hidden
    K_pad = _round_up(K, 128)
    N_pad = _round_up(N, 128)
    in_bytes = jnp.dtype(compute_dtype).itemsize
    out_bytes = jnp.dtype(out_dtype).itemsize

    # im2col: (B,C,H,W) -> (B,gh,gw,C,p,p) -> (M,K)  (+ cast + K zero-pad).
    # allow_input_fusion lets XLA fuse this into the Pallas x DMA stream.
    x = pixel_values.reshape(B, C, gh, p, gw, p)
    x = jnp.transpose(x, (0, 2, 4, 1, 3, 5)).reshape(M, K).astype(compute_dtype)
    if K_pad != K:
        x = jnp.pad(x, ((0, 0), (0, K_pad - K)))

    # Conv weight (hidden,C,p,p) -> (K,N), transposed once on the host:
    # the kernel then runs a standard MXU-friendly (M,K)x(K,N) contraction.
    w = jnp.transpose(weight.reshape(N, K)).astype(compute_dtype)
    w = jnp.pad(w, ((0, K_pad - K), (0, N_pad - N)))
    b = jnp.pad(bias.astype(jnp.float32), (0, N_pad - N)).reshape(1, N_pad)

    tile_m = _pick_tile_m(M, K_pad, N_pad, in_bytes, out_bytes)
    grid_m = pl.cdiv(M, tile_m)
    vmem_limit = int(min(
        max(2 * _vmem_footprint_bytes(tile_m, K_pad, N_pad, in_bytes, out_bytes),
            16 * 1024 * 1024),
        64 * 1024 * 1024))

    cost = pl.CostEstimate(
        flops=2 * M * K_pad * N_pad,
        bytes_accessed=(M * K_pad * in_bytes + K_pad * N_pad * in_bytes
                        + N_pad * 4 + M * N_pad * out_bytes),
        transcendentals=0,
    )

    def _call(resident_mode):
        extra = {} if resident_mode is None else dict(pipeline_mode=resident_mode)
        return pl.pallas_call(
            _patch_proj_kernel,
            out_shape=jax.ShapeDtypeStruct((M, N_pad), out_dtype),
            grid_spec=pltpu.PrefetchScalarGridSpec(
                num_scalar_prefetch=0,
                grid=(grid_m,),
                in_specs=[
                    pl.BlockSpec((tile_m, K_pad), lambda i: (i, 0)),   # x walks M
                    pl.BlockSpec((K_pad, N_pad), lambda i: (0, 0),
                                 **extra),                             # w resident
                    pl.BlockSpec((1, N_pad), lambda i: (0, 0),
                                 **extra),                             # b resident
                ],
                out_specs=pl.BlockSpec((tile_m, N_pad), lambda i: (i, 0)),
            ),
            compiler_params=pltpu.CompilerParams(
                dimension_semantics=("parallel",),        # megacore on v7x
                allow_input_fusion=[True, False, False],  # fuse im2col into x
                vmem_limit_bytes=vmem_limit,
            ),
            cost_estimate=cost,
        )(x, w, b)

    try:
        # w/b blocks never change index -> single VMEM copy (frees VMEM,
        # matters most on v7x's 64 MiB/TC).
        out = _call(pl.Buffered(1))
    except Exception:
        # Fallback for JAX builds without pipeline_mode support on this path.
        out = _call(None)

    if N_pad != N:
        out = out[:, :N]
    return out.reshape(B, num_patches, N)


def reference(pixel_values, weight, bias, patch_size):
    """Pure-JAX Conv2d(stride=kernel=patch) + flatten + transpose, with the
    same bf16 input rounding the kernel applies (f32 accumulation)."""
    pv = pixel_values.astype(jnp.bfloat16).astype(jnp.float32)
    w = weight.astype(jnp.bfloat16).astype(jnp.float32)
    out = jax.lax.conv_general_dilated(
        pv, w,
        window_strides=(patch_size, patch_size),
        padding="VALID",
        dimension_numbers=("NCHW", "OIHW", "NCHW"),
    ) + bias[None, :, None, None]
    B, hid, gh, gw = out.shape
    return jnp.transpose(out.reshape(B, hid, gh * gw), (0, 2, 1))


if __name__ == "__main__":
    # Module config: input_chans=4, hidden_dim=32, patch_size=4, image_size=16
    B, C, H, W = 2, 4, 16, 16
    hidden_dim, patch_size = 32, 4
    num_patches = (H // patch_size) * (W // patch_size)

    key = jax.random.PRNGKey(0)
    k_pix, k_w, k_b = jax.random.split(key, 3)
    pixel_values = jax.random.normal(k_pix, (B, C, H, W), dtype=jnp.float32)

    # 1) Module-faithful params: Conv2d weight initialized to 1, bias to 0.
    weight = jnp.ones((hidden_dim, C, patch_size, patch_size), dtype=jnp.float32)
    bias = jnp.zeros((hidden_dim,), dtype=jnp.float32)

    out = jax.block_until_ready(
        vit_patch_embeddings(pixel_values, weight, bias, patch_size))
    ref = reference(pixel_values, weight, bias, patch_size)
    assert out.shape == (B, num_patches, hidden_dim)
    assert out.dtype == jnp.float32
    assert jnp.allclose(out, ref, atol=2e-3, rtol=2e-3)

    # 2) Random weights/bias: catches im2col / weight-ordering / padding bugs
    #    (the ones-weight case is permutation-invariant along K).
    weight_r = 0.1 * jax.random.normal(
        k_w, (hidden_dim, C, patch_size, patch_size), dtype=jnp.float32)
    bias_r = 0.1 * jax.random.normal(k_b, (hidden_dim,), dtype=jnp.float32)

    out_r = jax.block_until_ready(
        vit_patch_embeddings(pixel_values, weight_r, bias_r, patch_size))
    ref_r = reference(pixel_values, weight_r, bias_r, patch_size)
    assert jnp.allclose(out_r, ref_r, atol=2e-3, rtol=2e-3)

    # 3) bf16-output variant (for bf16 downstream stacks), looser tolerance.
    out_bf = jax.block_until_ready(
        vit_patch_embeddings(pixel_values, weight_r, bias_r, patch_size,
                             out_dtype=jnp.bfloat16))
    assert out_bf.dtype == jnp.bfloat16
    assert jnp.allclose(out_bf.astype(jnp.float32), ref_r, atol=6e-2, rtol=2e-2)

    print("KERNEL_OK")
</pallas_src>

<mosaic_0001>
module attributes {stable_mosaic.version = 11 : i64} {
  func.func @_patch_proj_kernel(%arg0: i32, %arg1: memref<16x128xbf16, #tpu.memory_space<vmem>>, %arg2: memref<128x128xbf16, #tpu.memory_space<vmem>>, %arg3: memref<1x128xf32, #tpu.memory_space<vmem>>, %arg4: memref<16x128xf32, #tpu.memory_space<vmem>>) attributes {dimension_semantics = [#tpu.dimension_semantics<parallel>], iteration_bounds = array<i64: 2>, scalar_prefetch = 0 : i64, scratch_operands = 0 : i64, tpu.core_type = #tpu.core_type<tc>, window_params = [{transform_indices = @transform_0, window_bounds = array<i64: 16, 128>}, {pipeline_mode = #tpu.pipeline_mode<synchronous>, transform_indices = @transform_1, window_bounds = array<i64: 128, 128>}, {pipeline_mode = #tpu.pipeline_mode<synchronous>, transform_indices = @transform_2, window_bounds = array<i64: 1, 128>}, {transform_indices = @transform_3, window_bounds = array<i64: 16, 128>}]} {
    %c0 = arith.constant 0 : index
    %c0_0 = arith.constant 0 : index
    %0 = vector.load %arg1[%c0, %c0_0] : memref<16x128xbf16, #tpu.memory_space<vmem>>, vector<16x128xbf16>
    %c0_1 = arith.constant 0 : index
    %c0_2 = arith.constant 0 : index
    %1 = vector.load %arg2[%c0_1, %c0_2] : memref<128x128xbf16, #tpu.memory_space<vmem>>, vector<128x128xbf16>
    %cst = arith.constant dense<0.000000e+00> : vector<16x128xf32>
    %2 = tpu.matmul %0, %1, %cst {dimension_numbers = #tpu.dot_dimension_numbers<[1], [0], [0], [1], [0, 0, 1, 1], [], []>} : vector<16x128xbf16>, vector<128x128xbf16>, vector<16x128xf32> -> vector<16x128xf32>
    %c0_3 = arith.constant 0 : index
    %c0_4 = arith.constant 0 : index
    %3 = vector.load %arg3[%c0_3, %c0_4] : memref<1x128xf32, #tpu.memory_space<vmem>>, vector<1x128xf32>
    %4 = vector.broadcast %3 : vector<1x128xf32> to vector<16x128xf32>
    %5 = arith.addf %2, %4 : vector<16x128xf32>
    %c0_5 = arith.constant 0 : index
    %c0_6 = arith.constant 0 : index
    %6 = vector.load %arg4[%c0_5, %c0_6] : memref<16x128xf32, #tpu.memory_space<vmem>>, vector<16x128xf32>
    tpu.vector_store %arg4[%c0_5, %c0_6], %5 {strides = array<i32>} : memref<16x128xf32, #tpu.memory_space<vmem>>, vector<16x128xf32>,
    return
  }
  func.func @transform_0(%arg0: i32) -> (i32, i32) {
    %c0_i32 = arith.constant 0 : i32
    %c0_i32_0 = arith.constant 0 : i32
    return %arg0, %c0_i32 : i32, i32
  }
  func.func @transform_1(%arg0: i32) -> (i32, i32) {
    %c0_i32 = arith.constant 0 : i32
    %c0_i32_0 = arith.constant 0 : i32
    %c0_i32_1 = arith.constant 0 : i32
    return %c0_i32, %c0_i32_0 : i32, i32
  }
  func.func @transform_2(%arg0: i32) -> (i32, i32) {
    %c0_i32 = arith.constant 0 : i32
    %c0_i32_0 = arith.constant 0 : i32
    %c0_i32_1 = arith.constant 0 : i32
    return %c0_i32, %c0_i32_0 : i32, i32
  }
  func.func @transform_3(%arg0: i32) -> (i32, i32) {
    %c0_i32 = arith.constant 0 : i32
    %c0_i32_0 = arith.constant 0 : i32
    return %arg0, %c0_i32 : i32, i32
  }
}

module attributes {stable_mosaic.version = 11 : i64} {
  func.func @_patch_proj_kernel(%arg0: i32, %arg1: memref<16x128xbf16, #tpu.memory_space<vmem>>, %arg2: memref<128x128xbf16, #tpu.memory_space<vmem>>, %arg3: memref<1x128xf32, #tpu.memory_space<vmem>>, %arg4: memref<16x128xf32, #tpu.memory_space<vmem>>) attributes {dimension_semantics = [#tpu.dimension_semantics<parallel>], iteration_bounds = array<i64: 2>, scalar_prefetch = 0 : i64, scratch_operands = 0 : i64, tpu.core_type = #tpu.core_type<tc>, window_params = [{transform_indices = @transform_0, window_bounds = array<i64: 16, 128>}, {pipeline_mode = #tpu.pipeline_mode<synchronous>, transform_indices = @transform_1, window_bounds = array<i64: 128, 128>}, {pipeline_mode = #tpu.pipeline_mode<synchronous>, transform_indices = @transform_2, window_bounds = array<i64: 1, 128>}, {transform_indices = @transform_3, window_bounds = array<i64: 16, 128>}]} {
    %c0 = arith.constant 0 : index
    %c0_0 = arith.constant 0 : index
    %0 = vector.load %arg1[%c0, %c0_0] : memref<16x128xbf16, #tpu.memory_space<vmem>>, vector<16x128xbf16>
    %c0_1 = arith.constant 0 : index
    %c0_2 = arith.constant 0 : index
    %1 = vector.load %arg2[%c0_1, %c0_2] : memref<128x128xbf16, #tpu.memory_space<vmem>>, vector<128x128xbf16>
    %cst = arith.constant dense<0.000000e+00> : vector<16x128xf32>
    %2 = tpu.matmul %0, %1, %cst {dimension_numbers = #tpu.dot_dimension_numbers<[1], [0], [0], [1], [0, 0, 1, 1], [], []>} : vector<16x128xbf16>, vector<128x128xbf16>, vector<16x128xf32> -> vector<16x128xf32>
    %c0_3 = arith.constant 0 : index
    %c0_4 = arith.constant 0 : index
    %3 = vector.load %arg3[%c0_3, %c0_4] : memref<1x128xf32, #tpu.memory_space<vmem>>, vector<1x128xf32>
    %4 = vector.broadcast %3 : vector<1x128xf32> to vector<16x128xf32>
    %5 = arith.addf %2, %4 : vector<16x128xf32>
    %c0_5 = arith.constant 0 : index
    %c0_6 = arith.constant 0 : index
    %6 = vector.load %arg4[%c0_5, %c0_6] : memref<16x128xf32, #tpu.memory_space<vmem>>, vector<16x128xf32>
    tpu.vector_store %arg4[%c0_5, %c0_6], %5 {strides = array<i32>} : memref<16x128xf32, #tpu.memory_space<vmem>>, vector<16x128xf32>,
    return
  }
  func.func @transform_0(%arg0: i32) -> (i32, i32) {
    %c0_i32 = arith.constant 0 : i32
    %c0_i32_0 = arith.constant 0 : i32
    return %arg0, %c0_i32 : i32, i32
  }
  func.func @transform_1(%arg0: i32) -> (i32, i32) {
    %c0_i32 = arith.constant 0 : i32
    %c0_i32_0 = arith.constant 0 : i32
    %c0_i32_1 = arith.constant 0 : i32
    return %c0_i32, %c0_i32_0 : i32, i32
  }
  func.func @transform_2(%arg0: i32) -> (i32, i32) {
    %c0_i32 = arith.constant 0 : i32
    %c0_i32_0 = arith.constant 0 : i32
    %c0_i32_1 = arith.constant 0 : i32
    return %c0_i32, %c0_i32_0 : i32, i32
  }
  func.func @transform_3(%arg0: i32) -> (i32, i32) {
    %c0_i32 = arith.constant 0 : i32
    %c0_i32_0 = arith.constant 0 : i32
    return %arg0, %c0_i32 : i32, i32
  }
}

</mosaic_0001>

<bundles_post_ra>
// kernel: tpu_custom_call.1
= control target key start
LH: loop header
LB: loop body
LE: loop exit
PB: predicated region body
PF: predicated region fallthrough
CT: control target
= control target key end

     0   :  { %8 = vsyncpa [#allocation3], 0  ;;  %s928_s0 = inlined_call_operand.hbm [shape: bf16[32,128], index: 0, kind: input, shape index: {}]   ;;  %s929_s1 = inlined_call_operand.hbm [shape: bf16[128,128], index: 1, kind: input, shape index: {}]   ;;  %s930_s2 = inlined_call_operand.vmem [shape: f32[1,128], index: 2, kind: input, shape index: {}]   ;;  %s931_s3 = inlined_call_operand.hbm [shape: f32[32,128], index: 3, kind: output, shape index: {}]  }
   0x1   :  { %10 = vsyncpa [#allocation3 + $0x1], 0 }
   0x2   :  { %11 = vsyncpa [#allocation6], 0 }
   0x3   :  { %12 = vsyncpa [#allocation4], 0 }
   0x4   :  { %14 = vsyncpa [#allocation4 + $0x1], 0  ;;  %s714_s12 = smov 0   ;;  %s716_s13 = smov 0  }
   0x5   :  { %s718_s14 = smov 0   ;;  %s720_s15 = smov 0  }
   0x6 LB: > { %s735_s16 = sadd.s32 4294967295, %s683_s15   ;;  %s426_s17 = sadd.s32 4294967294, %s683_s15   ;;  %s683_s15 = sphi %s720_s15, %s951_s15   ;;  %s679_s14 = sphi %s718_s14, %s950_s14   ;;  %s675_s13 = sphi %s716_s13, %s949_s13   ;;  %s671_s12 = sphi %s714_s12, %s948_s12  }
   0x7   : > { %p40_p0 = scmp.ne.s32.totalorder %s675_s13, %s671_s12  ;;  %p932_p1 = scmp.eq.s32.totalorder %s735_s16, 0 }
   0x8   : > { %p112_p3 = scmp.eq.s32.totalorder %s426_s17, 1  ;;  %p427_p5 = scmp.ge.s32.totalorder %s683_s15, 1 }
   0x9   : > { %p744_p4 = por %p932_p1, %p40_p0  ;;  %p119_p7 = scmp.lt.s32.totalorder %s683_s15, 3 }
   0xa   : > { %p749_p6 = por %p112_p3, %p40_p0  ;;  %s685_s21 = smov [#allocation5]  }
   0xb   : > { %s935_s18 = scalar_select %p744_p4, 1, 0 }
   0xc   : > { %s936_s19 = scalar_select %p749_p6, 1, 0 }
   0xd   : > { %p754_p8 = pnand %p427_p5, %p119_p7  ;;  %s131_s22 = sshll.u32 %s685_s21, 4  ;;  %s758_s22 = int_to_ptr.vmem [resolvable:$true] %s131_s22 }
   0xe   : > { %s770_s24 = sadd.s32 1, %s683_s15   ;;  %s27_s25 = sadd.s32 1, %s679_s14 }
   0xf   : > { %s937_s20 = scalar_select %p754_p8, 1, 0 }
  0x10   : > { %p491_p9 = pneg %p754_p8  ;;  %s24_s26 = ssub.s32 %s683_s15, %s770_s24 }
  0x11   : > { %s555_s29 = scalar_lea.hbm %s929_s1, 1024 }
  0x12   : > { %p765_p11 = pnand %p491_p9, %p932_p1  ;;  %p556_p12 = scmp.ne.s32.totalorder %s929_s1, %s555_s29 }
  0x13   : > { %p562_p5 = scmp.lt.u32.totalorder %s555_s29, %s929_s1 }
  0x14   : > { %p557_p13 = pneg %p765_p11 }
  0x16   : > { %p558_p0 = pnand %p557_p13, %p556_p12 }
  0x18   : > { %p559_p3 = pneg %p558_p0 }
  0x1a   : > { %p564_p7 = pnand %p562_p5, %p559_p3 }
  0x1c   : > { %567 = shalt.err (!%p564_p7)
}
  0x1d   : > { %s568_s7 = scalar_lea.vmem %s758_s22, 1024  ;;  %p576_p2 = scmp.lt.s32.totalorder %s758_s22, %s758_s22 }
  0x1e   : > { %p569_p9 = scmp.ne.s32.totalorder %s758_s22, %s568_s7  ;;  %p577_p6 = scmp.lt.s32.totalorder %s568_s7, %s568_s7 }
  0x20   : > { %p571_p10 = pnand %p569_p9, %p557_p13  ;;  %p578_p4 = por %p577_p6, %p576_p2 }
  0x22   : > { %p572_p1 = pneg %p571_p10 }
  0x24   : > { %p579_p8 = pnand %p578_p4, %p572_p1 }
  0x26   : > { %582 = shalt.err (!%p579_p8)
}
  0x27   : > { %s686_s8 = smov 64   ;;  %s687_s9 = smov 4  }
  0x28   : > { %494 = dma.hbm_to_vmem [thread:$0]  (!%p765_p11), %s929_s1, 1024, %s758_s22, [#allocation6], %s686_s8, %s686_s8, %s687_s9  }
  0x29   : > { %p25_p1 = scmp.eq.s32.totalorder %s24_s26, 0  ;;  %p34_p2 = scmp.ne.s32.totalorder %s679_s14, %s675_s13 }
  0x2a   : > { %p35_p4 = scmp.eq.s32.totalorder %s683_s15, 0  ;;  %p504_p6 = scmp.lt.s32.totalorder %s683_s15, 2 }
  0x2b   : > { %s804_s17 = scalar_select %p25_p1, %s679_s14, %s27_s25  }
  0x2c   : > { %p36_p8 = por %p35_p4, %p34_p2  ;;  %p939_p10 = scmp.eq.s32.totalorder %s735_s16, 1 }
  0x2d   : > { %s148_s23 = sand.u32 1, %s679_s14   ;;  %s452_s27 = sshll.u32 %s683_s15, 7 }
  0x2e   : > { %p808_p12 = por %p939_p10, %p34_p2  ;;  %s430_s28 = sshll.u32 %s148_s23, 3 }
  0x2f   : > { %s817_s4 = scalar_lea.hbm %s928_s0, %s452_s27  ;;  %s152_s22 = scalar_lea.vmem [#allocation2], %s430_s28 }
  0x30   : > { %s159_s25 = sshll.u32 %s152_s22, 4  ;;  %p819_p11 = pnand %p504_p6, %p36_p8  ;;  %s823_s25 = int_to_ptr.vmem [resolvable:$true] %s159_s25 }
  0x31   : > { %s825_s5 = scalar_lea.sflag [#allocation3], %s148_s23  ;;  %s583_s6 = scalar_lea.hbm %s817_s4, 128 }
  0x32   : > { %p584_p13 = scmp.ne.s32.totalorder %s817_s4, %s583_s6  ;;  %p585_p0 = pneg %p819_p11 }
  0x33   : > { %s588_s11 = scalar_lea.hbm %s928_s0, 256  ;;  %p589_p7 = scmp.lt.u32.totalorder %s817_s4, %s928_s0 }
  0x34   : > { %p586_p3 = pnand %p585_p0, %p584_p13  ;;  %p590_p9 = scmp.lt.u32.totalorder %s588_s11, %s583_s6 }
  0x35   : > { %p592_p2 = scmp.lt.u32.totalorder %s583_s6, %s817_s4 }
  0x36   : > { %p587_p5 = pneg %p586_p3  ;;  %p591_p1 = por %p590_p9, %p589_p7 }
  0x38   : > { %p593_p4 = por %p592_p2, %p591_p1 }
  0x3a   : > { %p594_p6 = pnand %p593_p4, %p587_p5 }
  0x3c   : > { %597 = shalt.err (!%p594_p6)
}
  0x3d   : > { %s598_s23 = scalar_lea.vmem %s823_s25, 128  ;;  %s688_s29 = smov [#allocation2]  }
  0x3e   : > { %p599_p8 = scmp.ne.s32.totalorder %s823_s25, %s598_s23  ;;  %s603_s30 = sshll.u32 %s688_s29, 4  ;;  %s604_s30 = int_to_ptr.vmem [resolvable:$false] %s603_s30 }
  0x3f   : > { %s605_s22 = scalar_lea.vmem %s604_s30, 256  ;;  %p606_p3 = scmp.lt.s32.totalorder %s823_s25, %s604_s30 }
  0x40   : > { %p601_p10 = pnand %p599_p8, %p585_p0  ;;  %p607_p7 = scmp.lt.s32.totalorder %s605_s22, %s598_s23 }
  0x42   : > { %p602_p13 = pneg %p601_p10  ;;  %p608_p9 = por %p607_p7, %p606_p3 }
  0x44   : > { %p609_p1 = pnand %p608_p9, %p602_p13 }
  0x46   : > { %612 = shalt.err (!%p609_p1)
}
  0x47   : > { %498 = dma.hbm_to_vmem [thread:$0]  (!%p819_p11), %s817_s4, 128, %s823_s25, %s825_s5, %s686_s8, %s686_s8, %s687_s9  }
  0x48   : > { %p942_p0 = scmp.ne.s32.totalorder %s937_s20, 0 }
  0x49   : > { %s859_s6 = sand.u32 (!%p942_p0), 1, %s675_s13   ;;  %p943_p5 = scmp.ne.s32.totalorder (!%p942_p0), %s935_s18, 0 }
  0x4a   : > { %171 = sbr.rel (%p942_p0) target bundleno = 349 (0x15d), region = 32  ;;  %s434_s7 = sshll.u32 (!%p942_p0), %s859_s6, 3 }
  0x4b   : > { %s174_s10 = scalar_lea.sflag (!%p942_p0), [#allocation3], %s859_s6  ;;  %s863_s11 = scalar_lea.vmem (!%p942_p0), [#allocation2], %s434_s7 }
  0x51   : > { %658 = dma.done.wait (%p943_p5), %s174_s10, 128  }
  0x52   : > { %660 = vsyncadd (%p943_p5), %s174_s10, 4294967168  ;;  %p944_p11 = scmp.eq.s32.totalorder %s735_s16, 0 }
  0x54   : > { %662 = dma.done.wait (%p944_p11), [#allocation6], 1024   ;;  %p945_p2 = pmov %p944_p11 }
  0x55   : > { %v689_v0 = vmov 0.0   ;;  %vm690_vm0 = vmmov 0   ;;  %v546_v1 = vld [vmem:[#allocation5] sm:$0xff]   ;;  %v547_v2 = vld [vmem:[#allocation5 + $0x8] sm:$0xff]   ;;  %v548_v3 = vld [vmem:[#allocation5 + $0x10] sm:$0xff]   ;;  %s436_s18 = sshll.u32 %s859_s6, 4 }
  0x56   : > { %664 = vsyncadd (%p945_p2), [#allocation6], 4294966272  ;;  %463 = vmatprep.subr.bf16.mxu0 %v689_v0  ;;  %479 = vmatprep.mubr.msk.bf16.mxu0 %vm690_vm0, %v689_v0  ;;  %v549_v4 = vld [vmem:[#allocation5 + $0x18] sm:$0xff]   ;;  %v550_v5 = vld [vmem:[#allocation5 + $0x20] sm:$0xff]   ;;  %s203_s9 = scalar_lea.vmem [#allocation7], %s436_s18  ;;  %s453_s25 = sshll.u32 %s735_s16, 8 }
  0x57   : > { %464 = vmatpush3.bf16.msra.mxu0 %v546_v1  ;;  %v551_v6 = vld [vmem:[#allocation5 + $0x28] sm:$0xff]   ;;  %v552_v7 = vld [vmem:[#allocation5 + $0x30] sm:$0xff]   ;;  %v553_v8 = vld [vmem:[#allocation5 + $0x38] sm:$0xff]   ;;  %s343_s4 = sshll.u32 %s203_s9, 4  ;;  %s884_s27 = scalar_lea.hbm %s931_s3, %s453_s25  ;;  %s879_s4 = int_to_ptr.vmem [resolvable:$true] %s343_s4 }
  0x58   : > { %465 = vmatprep.subr.bf16.mxu0 %v689_v0  ;;  %v554_v9 = vld [vmem:[%s863_s11] sm:$0xff]   ;;  %s330_s28 = scalar_lea.sflag [#allocation4], %s859_s6  ;;  %s613_s16 = scalar_lea.vmem %s879_s4, 256 }
  0x59   : > { %v437_v10 = vld [vmem:[%s930_s2] ss:$0 sm:$0xff]  ;;  %p614_p4 = scmp.ne.s32.totalorder %s879_s4, %s613_s16  ;;  %s691_s23 = smov [#allocation7]  }
  0x5a   : > { %s617_s29 = sshll.u32 %s691_s23, 4  ;;  %s618_s29 = int_to_ptr.vmem [resolvable:$false] %s617_s29 }
  0x5b   : > { %466 = vmatpush3.bf16.msra.mxu0 %v547_v2  ;;  %p615_p6 = pnand %p614_p4, %p808_p12  ;;  %s619_s30 = scalar_lea.vmem %s618_s29, 512 }
  0x5c   : > { %467 = vmatprep.subr.bf16.mxu0 %v689_v0  ;;  %p620_p10 = scmp.lt.s32.totalorder %s879_s4, %s618_s29  ;;  %p621_p13 = scmp.lt.s32.totalorder %s619_s30, %s613_s16 }
  0x5d   : > { %p616_p8 = pneg %p615_p6 }
  0x5e   : > { %p622_p3 = por %p621_p13, %p620_p10 }
  0x5f   : > { %468 = vmatpush3.bf16.msra.mxu0 %v548_v3 }
  0x60   : > { %469 = vmatprep.subr.bf16.mxu0 %v689_v0  ;;  %p623_p7 = pnand %p622_p3, %p616_p8 }
  0x63   : > { %470 = vmatpush3.bf16.msra.mxu0 %v549_v4 }
  0x64   : > { %471 = vmatprep.subr.bf16.mxu0 %v689_v0 }
  0x67   : > { %472 = vmatpush3.bf16.msra.mxu0 %v550_v5 }
  0x68   : > { %473 = vmatprep.subr.bf16.mxu0 %v689_v0 }
  0x6b   : > { %474 = vmatpush3.bf16.msra.mxu0 %v551_v6 }
  0x6c   : > { %475 = vmatprep.subr.bf16.mxu0 %v689_v0 }
  0x6f   : > { %476 = vmatpush3.bf16.msra.mxu0 %v552_v7 }
  0x70   : > { %477 = vmatprep.subr.bf16.mxu0 %v689_v0 }
  0x73   : > { %478 = vmatpush3.bf16.msra.mxu0 %v553_v8 }
  0x76   : > { %480 = vmatmul.mubr.bf16.vlgmr.msra.gmra.mrb[0].mxu0 %v554_v9 }
 0x149   : > { %v320_v11 = vpop.f32.mrb[0].mxu0 }
 0x14a   : > { %v321_v12 = vadd.f32 %v437_v10, %v320_v11  ;;  %v481_v13 = vpop.f32.mrb[1].mxu0 }
 0x14b   : > { %v323_v14 = vpop.f32.mrb[2].mxu0 }
 0x14c   : > { %327 = vst [vmem:[%s203_s9] sm:$0xff] %v321_v12  ;;  %v324_v15 = vadd.f32 %v437_v10, %v323_v14  ;;  %v482_v16 = vpop.f32.mrb[3].mxu0 }
 0x14e   : > { %328 = vst [vmem:[%s203_s9 + $0x8] sm:$0xff] %v324_v15 }
 0x14f   : > { %626 = shalt.err (!%p623_p7)
}
 0x150   : > { %s627_s22 = scalar_lea.hbm %s884_s27, 256  ;;  %s631_s11 = scalar_lea.hbm %s931_s3, 512 }
 0x151   : > { %p628_p9 = scmp.ne.s32.totalorder %s884_s27, %s627_s22  ;;  %p632_p5 = scmp.lt.u32.totalorder %s884_s27, %s931_s3 }
 0x152   : > { %p633_p11 = scmp.lt.u32.totalorder %s631_s11, %s627_s22  ;;  %p635_p4 = scmp.lt.u32.totalorder %s627_s22, %s884_s27 }
 0x153   : > { %p629_p1 = pnand %p628_p9, %p808_p12 }
 0x154   : > { %p634_p2 = por %p633_p11, %p632_p5 }
 0x155   : > { %p630_p0 = pneg %p629_p1 }
 0x156   : > { %p636_p6 = por %p635_p4, %p634_p2 }
 0x158   : > { %p637_p8 = pnand %p636_p6, %p630_p0 }
 0x15a   : > { %640 = shalt.err (!%p637_p8)
}
 0x15b   : > { %s692_s8 = smov 128   ;;  %s693_s9 = smov 8  }
 0x15c   : > { %489 = dma.vmem_to_hbm [thread:$0]  (%p808_p12), %s879_s4, 256, %s884_s27, %s330_s28, %s692_s8, %s692_s8, %s693_s9  }
 0x15d PF: > { %s358_s25 = sand.u32 1, %s671_s12   ;;  %p946_p10 = scmp.ne.s32.totalorder %s936_s19, 0 }
 0x15e   : > { %p947_p13 = scmp.ge.s32.totalorder %s683_s15, 2  ;;  %s359_s26 = scalar_lea.sflag [#allocation4], %s358_s25 }
 0x160   : > { %p500_p3 = pnand %p947_p13, %p946_p10 }
 0x162   : > { %666 = dma.done.wait (!%p500_p3), %s359_s26, 256  }
 0x163   : > { %668 = vsyncadd (!%p500_p3), %s359_s26, 4294967040  ;;  %p17_p7 = scmp.ge.s32.totalorder %s770_s24, 4   ;;  %s948_s12 = smov %s675_s13 }
 0x164   : > { %s949_s13 = smov %s679_s14  ;;  %s950_s14 = smov %s804_s17 }
 0x165   : > { %s951_s15 = smov %s770_s24  ;;  %19 = sbr.rel (!%p17_p7) target bundleno = 6 (0x6), region = 81 }
 0x16c   :  { %364 = vsyncpa [#allocation3], 1 }
 0x16d   :  { %366 = vsyncpa [#allocation3 + $0x1], 1 }
 0x16e   :  { %367 = vsyncpa [#allocation6], 1 }
 0x16f   :  { %368 = vsyncpa [#allocation4], 1 }
 0x170   :  { %370 = vsyncpa [#allocation4 + $0x1], 1 }

// kernel: tpu_custom_call.1
= control target key start
LH: loop header
LB: loop body
LE: loop exit
PB: predicated region body
PF: predicated region fallthrough
CT: control target
= control target key end

     0   :  { %8 = vsyncpa [#allocation3], 0  ;;  %s928_s0 = inlined_call_operand.hbm [shape: bf16[32,128], index: 0, kind: input, shape index: {}]   ;;  %s929_s1 = inlined_call_operand.hbm [shape: bf16[128,128], index: 1, kind: input, shape index: {}]   ;;  %s930_s2 = inlined_call_operand.vmem [shape: f32[1,128], index: 2, kind: input, shape index: {}]   ;;  %s931_s3 = inlined_call_operand.hbm [shape: f32[32,128], index: 3, kind: output, shape index: {}]  }
   0x1   :  { %10 = vsyncpa [#allocation3 + $0x1], 0 }
   0x2   :  { %11 = vsyncpa [#allocation6], 0 }
   0x3   :  { %12 = vsyncpa [#allocation4], 0 }
   0x4   :  { %14 = vsyncpa [#allocation4 + $0x1], 0  ;;  %s714_s12 = smov 0   ;;  %s716_s13 = smov 0  }
   0x5   :  { %s718_s14 = smov 0   ;;  %s720_s15 = smov 0  }
   0x6 LB: > { %s735_s16 = sadd.s32 4294967295, %s683_s15   ;;  %s426_s17 = sadd.s32 4294967294, %s683_s15   ;;  %s683_s15 = sphi %s720_s15, %s951_s15   ;;  %s679_s14 = sphi %s718_s14, %s950_s14   ;;  %s675_s13 = sphi %s716_s13, %s949_s13   ;;  %s671_s12 = sphi %s714_s12, %s948_s12  }
   0x7   : > { %p40_p0 = scmp.ne.s32.totalorder %s675_s13, %s671_s12  ;;  %p932_p1 = scmp.eq.s32.totalorder %s735_s16, 0 }
   0x8   : > { %p112_p3 = scmp.eq.s32.totalorder %s426_s17, 1  ;;  %p427_p5 = scmp.ge.s32.totalorder %s683_s15, 1 }
   0x9   : > { %p744_p4 = por %p932_p1, %p40_p0  ;;  %p119_p7 = scmp.lt.s32.totalorder %s683_s15, 3 }
   0xa   : > { %p749_p6 = por %p112_p3, %p40_p0  ;;  %s685_s21 = smov [#allocation5]  }
   0xb   : > { %s935_s18 = scalar_select %p744_p4, 1, 0 }
   0xc   : > { %s936_s19 = scalar_select %p749_p6, 1, 0 }
   0xd   : > { %p754_p8 = pnand %p427_p5, %p119_p7  ;;  %s131_s22 = sshll.u32 %s685_s21, 4  ;;  %s758_s22 = int_to_ptr.vmem [resolvable:$true] %s131_s22 }
   0xe   : > { %s770_s24 = sadd.s32 1, %s683_s15   ;;  %s27_s25 = sadd.s32 1, %s679_s14 }
   0xf   : > { %s937_s20 = scalar_select %p754_p8, 1, 0 }
  0x10   : > { %p491_p9 = pneg %p754_p8  ;;  %s24_s26 = ssub.s32 %s683_s15, %s770_s24 }
  0x11   : > { %s555_s29 = scalar_lea.hbm %s929_s1, 1024 }
  0x12   : > { %p765_p11 = pnand %p491_p9, %p932_p1  ;;  %p556_p12 = scmp.ne.s32.totalorder %s929_s1, %s555_s29 }
  0x13   : > { %p562_p5 = scmp.lt.u32.totalorder %s555_s29, %s929_s1 }
  0x14   : > { %p557_p13 = pneg %p765_p11 }
  0x16   : > { %p558_p0 = pnand %p557_p13, %p556_p12 }
  0x18   : > { %p559_p3 = pneg %p558_p0 }
  0x1a   : > { %p564_p7 = pnand %p562_p5, %p559_p3 }
  0x1c   : > { %567 = shalt.err (!%p564_p7)
}
  0x1d   : > { %s568_s7 = scalar_lea.vmem %s758_s22, 1024  ;;  %p576_p2 = scmp.lt.s32.totalorder %s758_s22, %s758_s22 }
  0x1e   : > { %p569_p9 = scmp.ne.s32.totalorder %s758_s22, %s568_s7  ;;  %p577_p6 = scmp.lt.s32.totalorder %s568_s7, %s568_s7 }
  0x20   : > { %p571_p10 = pnand %p569_p9, %p557_p13  ;;  %p578_p4 = por %p577_p6, %p576_p2 }
  0x22   : > { %p572_p1 = pneg %p571_p10 }
  0x24   : > { %p579_p8 = pnand %p578_p4, %p572_p1 }
  0x26   : > { %582 = shalt.err (!%p579_p8)
}
  0x27   : > { %s686_s8 = smov 64   ;;  %s687_s9 = smov 4  }
  0x28   : > { %494 = dma.hbm_to_vmem [thread:$0]  (!%p765_p11), %s929_s1, 1024, %s758_s22, [#allocation6], %s686_s8, %s686_s8, %s687_s9  }
  0x29   : > { %p25_p1 = scmp.eq.s32.totalorder %s24_s26, 0  ;;  %p34_p2 = scmp.ne.s32.totalorder %s679_s14, %s675_s13 }
  0x2a   : > { %p35_p4 = scmp.eq.s32.totalorder %s683_s15, 0  ;;  %p504_p6 = scmp.lt.s32.totalorder %s683_s15, 2 }
  0x2b   : > { %s804_s17 = scalar_select %p25_p1, %s679_s14, %s27_s25  }
  0x2c   : > { %p36_p8 = por %p35_p4, %p34_p2  ;;  %p939_p10 = scmp.eq.s32.totalorder %s735_s16, 1 }
  0x2d   : > { %s148_s23 = sand.u32 1, %s679_s14   ;;  %s452_s27 = sshll.u32 %s683_s15, 7 }
  0x2e   : > { %p808_p12 = por %p939_p10, %p34_p2  ;;  %s430_s28 = sshll.u32 %s148_s23, 3 }
  0x2f   : > { %s817_s4 = scalar_lea.hbm %s928_s0, %s452_s27  ;;  %s152_s22 = scalar_lea.vmem [#allocation2], %s430_s28 }
  0x30   : > { %s159_s25 = sshll.u32 %s152_s22, 4  ;;  %p819_p11 = pnand %p504_p6, %p36_p8  ;;  %s823_s25 = int_to_ptr.vmem [resolvable:$true] %s159_s25 }
  0x31   : > { %s825_s5 = scalar_lea.sflag [#allocation3], %s148_s23  ;;  %s583_s6 = scalar_lea.hbm %s817_s4, 128 }
  0x32   : > { %p584_p13 = scmp.ne.s32.totalorder %s817_s4, %s583_s6  ;;  %p585_p0 = pneg %p819_p11 }
  0x33   : > { %s588_s11 = scalar_lea.hbm %s928_s0, 256  ;;  %p589_p7 = scmp.lt.u32.totalorder %s817_s4, %s928_s0 }
  0x34   : > { %p586_p3 = pnand %p585_p0, %p584_p13  ;;  %p590_p9 = scmp.lt.u32.totalorder %s588_s11, %s583_s6 }
  0x35   : > { %p592_p2 = scmp.lt.u32.totalorder %s583_s6, %s817_s4 }
  0x36   : > { %p587_p5 = pneg %p586_p3  ;;  %p591_p1 = por %p590_p9, %p589_p7 }
  0x38   : > { %p593_p4 = por %p592_p2, %p591_p1 }
  0x3a   : > { %p594_p6 = pnand %p593_p4, %p587_p5 }
  0x3c   : > { %597 = shalt.err (!%p594_p6)
}
  0x3d   : > { %s598_s23 = scalar_lea.vmem %s823_s25, 128  ;;  %s688_s29 = smov [#allocation2]  }
  0x3e   : > { %p599_p8 = scmp.ne.s32.totalorder %s823_s25, %s598_s23  ;;  %s603_s30 = sshll.u32 %s688_s29, 4  ;;  %s604_s30 = int_to_ptr.vmem [resolvable:$false] %s603_s30 }
  0x3f   : > { %s605_s22 = scalar_lea.vmem %s604_s30, 256  ;;  %p606_p3 = scmp.lt.s32.totalorder %s823_s25, %s604_s30 }
  0x40   : > { %p601_p10 = pnand %p599_p8, %p585_p0  ;;  %p607_p7 = scmp.lt.s32.totalorder %s605_s22, %s598_s23 }
  0x42   : > { %p602_p13 = pneg %p601_p10  ;;  %p608_p9 = por %p607_p7, %p606_p3 }
  0x44   : > { %p609_p1 = pnand %p608_p9, %p602_p13 }
  0x46   : > { %612 = shalt.err (!%p609_p1)
}
  0x47   : > { %498 = dma.hbm_to_vmem [thread:$0]  (!%p819_p11), %s817_s4, 128, %s823_s25, %s825_s5, %s686_s8, %s686_s8, %s687_s9  }
  0x48   : > { %p942_p0 = scmp.ne.s32.totalorder %s937_s20, 0 }
  0x49   : > { %s859_s6 = sand.u32 (!%p942_p0), 1, %s675_s13   ;;  %p943_p5 = scmp.ne.s32.totalorder (!%p942_p0), %s935_s18, 0 }
  0x4a   : > { %171 = sbr.rel (%p942_p0) target bundleno = 349 (0x15d), region = 32  ;;  %s434_s7 = sshll.u32 (!%p942_p0), %s859_s6, 3 }
  0x4b   : > { %s174_s10 = scalar_lea.sflag (!%p942_p0), [#allocation3], %s859_s6  ;;  %s863_s11 = scalar_lea.vmem (!%p942_p0), [#allocation2], %s434_s7 }
  0x51   : > { %658 = dma.done.wait (%p943_p5), %s174_s10, 128  }
  0x52   : > { %660 = vsyncadd (%p943_p5), %s174_s10, 4294967168  ;;  %p944_p11 = scmp.eq.s32.totalorder %s735_s16, 0 }
  0x54   : > { %662 = dma.done.wait (%p944_p11), [#allocation6], 1024   ;;  %p945_p2 = pmov %p944_p11 }
  0x55   : > { %v689_v0 = vmov 0.0   ;;  %vm690_vm0 = vmmov 0   ;;  %v546_v1 = vld [vmem:[#allocation5] sm:$0xff]   ;;  %v547_v2 = vld [vmem:[#allocation5 + $0x8] sm:$0xff]   ;;  %v548_v3 = vld [vmem:[#allocation5 + $0x10] sm:$0xff]   ;;  %s436_s18 = sshll.u32 %s859_s6, 4 }
  0x56   : > { %664 = vsyncadd (%p945_p2), [#allocation6], 4294966272  ;;  %463 = vmatprep.subr.bf16.mxu0 %v689_v0  ;;  %479 = vmatprep.mubr.msk.bf16.mxu0 %vm690_vm0, %v689_v0  ;;  %v549_v4 = vld [vmem:[#allocation5 + $0x18] sm:$0xff]   ;;  %v550_v5 = vld [vmem:[#allocation5 + $0x20] sm:$0xff]   ;;  %s203_s9 = scalar_lea.vmem [#allocation7], %s436_s18  ;;  %s453_s25 = sshll.u32 %s735_s16, 8 }
  0x57   : > { %464 = vmatpush3.bf16.msra.mxu0 %v546_v1  ;;  %v551_v6 = vld [vmem:[#allocation5 + $0x28] sm:$0xff]   ;;  %v552_v7 = vld [vmem:[#allocation5 + $0x30] sm:$0xff]   ;;  %v553_v8 = vld [vmem:[#allocation5 + $0x38] sm:$0xff]   ;;  %s343_s4 = sshll.u32 %s203_s9, 4  ;;  %s884_s27 = scalar_lea.hbm %s931_s3, %s453_s25  ;;  %s879_s4 = int_to_ptr.vmem [resolvable:$true] %s343_s4 }
  0x58   : > { %465 = vmatprep.subr.bf16.mxu0 %v689_v0  ;;  %v554_v9 = vld [vmem:[%s863_s11] sm:$0xff]   ;;  %s330_s28 = scalar_lea.sflag [#allocation4], %s859_s6  ;;  %s613_s16 = scalar_lea.vmem %s879_s4, 256 }
  0x59   : > { %v437_v10 = vld [vmem:[%s930_s2] ss:$0 sm:$0xff]  ;;  %p614_p4 = scmp.ne.s32.totalorder %s879_s4, %s613_s16  ;;  %s691_s23 = smov [#allocation7]  }
  0x5a   : > { %s617_s29 = sshll.u32 %s691_s23, 4  ;;  %s618_s29 = int_to_ptr.vmem [resolvable:$false] %s617_s29 }
  0x5b   : > { %466 = vmatpush3.bf16.msra.mxu0 %v547_v2  ;;  %p615_p6 = pnand %p614_p4, %p808_p12  ;;  %s619_s30 = scalar_lea.vmem %s618_s29, 512 }
  0x5c   : > { %467 = vmatprep.subr.bf16.mxu0 %v689_v0  ;;  %p620_p10 = scmp.lt.s32.totalorder %s879_s4, %s618_s29  ;;  %p621_p13 = scmp.lt.s32.totalorder %s619_s30, %s613_s16 }
  0x5d   : > { %p616_p8 = pneg %p615_p6 }
  0x5e   : > { %p622_p3 = por %p621_p13, %p620_p10 }
  0x5f   : > { %468 = vmatpush3.bf16.msra.mxu0 %v548_v3 }
  0x60   : > { %469 = vmatprep.subr.bf16.mxu0 %v689_v0  ;;  %p623_p7 = pnand %p622_p3, %p616_p8 }
  0x63   : > { %470 = vmatpush3.bf16.msra.mxu0 %v549_v4 }
  0x64   : > { %471 = vmatprep.subr.bf16.mxu0 %v689_v0 }
  0x67   : > { %472 = vmatpush3.bf16.msra.mxu0 %v550_v5 }
  0x68   : > { %473 = vmatprep.subr.bf16.mxu0 %v689_v0 }
  0x6b   : > { %474 = vmatpush3.bf16.msra.mxu0 %v551_v6 }
  0x6c   : > { %475 = vmatprep.subr.bf16.mxu0 %v689_v0 }
  0x6f   : > { %476 = vmatpush3.bf16.msra.mxu0 %v552_v7 }
  0x70   : > { %477 = vmatprep.subr.bf16.mxu0 %v689_v0 }
  0x73   : > { %478 = vmatpush3.bf16.msra.mxu0 %v553_v8 }
  0x76   : > { %480 = vmatmul.mubr.bf16.vlgmr.msra.gmra.mrb[0].mxu0 %v554_v9 }
 0x149   : > { %v320_v11 = vpop.f32.mrb[0].mxu0 }
 0x14a   : > { %v321_v12 = vadd.f32 %v437_v10, %v320_v11  ;;  %v481_v13 = vpop.f32.mrb[1].mxu0 }
 0x14b   : > { %v323_v14 = vpop.f32.mrb[2].mxu0 }
 0x14c   : > { %327 = vst [vmem:[%s203_s9] sm:$0xff] %v321_v12  ;;  %v324_v15 = vadd.f32 %v437_v10, %v323_v14  ;;  %v482_v16 = vpop.f32.mrb[3].mxu0 }
 0x14e   : > { %328 = vst [vmem:[%s203_s9 + $0x8] sm:$0xff] %v324_v15 }
 0x14f   : > { %626 = shalt.err (!%p623_p7)
}
 0x150   : > { %s627_s22 = scalar_lea.hbm %s884_s27, 256  ;;  %s631_s11 = scalar_lea.hbm %s931_s3, 512 }
 0x151   : > { %p628_p9 = scmp.ne.s32.totalorder %s884_s27, %s627_s22  ;;  %p632_p5 = scmp.lt.u32.totalorder %s884_s27, %s931_s3 }
 0x152   : > { %p633_p11 = scmp.lt.u32.totalorder %s631_s11, %s627_s22  ;;  %p635_p4 = scmp.lt.u32.totalorder %s627_s22, %s884_s27 }
 0x153   : > { %p629_p1 = pnand %p628_p9, %p808_p12 }
 0x154   : > { %p634_p2 = por %p633_p11, %p632_p5 }
 0x155   : > { %p630_p0 = pneg %p629_p1 }
 0x156   : > { %p636_p6 = por %p635_p4, %p634_p2 }
 0x158   : > { %p637_p8 = pnand %p636_p6, %p630_p0 }
 0x15a   : > { %640 = shalt.err (!%p637_p8)
}
 0x15b   : > { %s692_s8 = smov 128   ;;  %s693_s9 = smov 8  }
 0x15c   : > { %489 = dma.vmem_to_hbm [thread:$0]  (%p808_p12), %s879_s4, 256, %s884_s27, %s330_s28, %s692_s8, %s692_s8, %s693_s9  }
 0x15d PF: > { %s358_s25 = sand.u32 1, %s671_s12   ;;  %p946_p10 = scmp.ne.s32.totalorder %s936_s19, 0 }
 0x15e   : > { %p947_p13 = scmp.ge.s32.totalorder %s683_s15, 2  ;;  %s359_s26 = scalar_lea.sflag [#allocation4], %s358_s25 }
 0x160   : > { %p500_p3 = pnand %p947_p13, %p946_p10 }
 0x162   : > { %666 = dma.done.wait (!%p500_p3), %s359_s26, 256  }
 0x163   : > { %668 = vsyncadd (!%p500_p3), %s359_s26, 4294967040  ;;  %p17_p7 = scmp.ge.s32.totalorder %s770_s24, 4   ;;  %s948_s12 = smov %s675_s13 }
 0x164   : > { %s949_s13 = smov %s679_s14  ;;  %s950_s14 = smov %s804_s17 }
 0x165   : > { %s951_s15 = smov %s770_s24  ;;  %19 = sbr.rel (!%p17_p7) target bundleno = 6 (0x6), region = 81 }
 0x16c   :  { %364 = vsyncpa [#allocation3], 1 }
 0x16d   :  { %366 = vsyncpa [#allocation3 + $0x1], 1 }
 0x16e   :  { %367 = vsyncpa [#allocation6], 1 }
 0x16f   :  { %368 = vsyncpa [#allocation4], 1 }
 0x170   :  { %370 = vsyncpa [#allocation4 + $0x1], 1 }

</bundles_post_ra>
